<compile_context>
chip_gen: v6e
topology: v6e:2x2x1
jax: 0.10.0
libtpu: 0.0.40
codegen_flags: <defaults>
</compile_context>

<pallas_src>
import jax
import jax.numpy as jnp
import numpy as np
from jax import lax
from jax.experimental import pallas as pl
from jax.experimental.pallas import tpu as pltpu

EPS = 1e-5


def _round_up(x, m):
    return ((x + m - 1) // m) * m


# --------------------------------------------------------------------------
# Fused kernel: RevIN-norm + (folded start_fc + projection) + RevIN-denorm.
# Grid: (num_row_tiles,), rows = flattened (batch, feature) pairs.
# --------------------------------------------------------------------------
def pathformer_rows_kernel(x_ref, w_ref, b_ref, o_ref):
    # x_ref: (RT, L)    row tile of the (B*M, L) input, f32
    # w_ref: (L, Pp)    folded projection weight, P padded to a 128 multiple
    # b_ref: (1, Pp)    folded projection bias, f32
    # o_ref: (RT, Pp)   lane-dense output tile, f32
    x = x_ref[...]

    # RevIN 'norm' statistics (biased variance, eps inside sqrt).
    mean = jnp.mean(x, axis=1, keepdims=True)                # (RT, 1)
    var = jnp.mean((x - mean) ** 2, axis=1, keepdims=True)   # (RT, 1)
    rstd = lax.rsqrt(var + EPS)                              # EUP
    std = jnp.sqrt(var + EPS)                                # EUP
    xn = (x - mean) * rstd                                   # (RT, L)  f32

    # Folded start_fc + projection: (RT, L) @ (L, Pp) on the MXU.
    y = jnp.dot(xn.astype(w_ref.dtype), w_ref[...],
                preferred_element_type=jnp.float32) + b_ref[...]

    # RevIN 'denorm' (per-row stats broadcast along lanes).
    o_ref[...] = y * std + mean


# --------------------------------------------------------------------------
# Wrapper
# --------------------------------------------------------------------------
def pathformer_forward(x, params, *, mxu_dtype=jnp.float32):
    """x: [B, L, M] float32 -> [B, pred_len, M] float32.

    mxu_dtype=jnp.bfloat16 enables the fast MXU path on v6e/v7x (dot operands
    only; RevIN math stays f32).  Default f32 for bit-tight validation.
    """
    B, L, M = x.shape
    w_fc = params["start_fc_w"]      # (1, D)  start_fc weight (Linear(1, D))
    b_fc = params["start_fc_b"]      # (1, D)  start_fc bias
    w_p = params["proj_w"]           # (L*D, P) projection weight (transposed)
    b_p = params["proj_b"]           # (1, P)
    D = w_fc.shape[1]
    P = w_p.shape[1]

    # ---- Offline weight folding (exact while the AMS stack is identity) ----
    # TODO(synk): if AMS layers are added, drop this folding and apply
    #             start_fc / projections explicitly around the AMS stack.
    w3 = w_p.reshape(L, D, P)
    w_eff = jnp.einsum("d,ldp->lp", w_fc[0], w3)                  # (L, P)
    b_eff = jnp.einsum("d,ldp->p", b_fc[0], w3) + b_p[0]          # (P,)

    # Lane-dense output: pad pred_len to a multiple of 128.
    P_pad = _round_up(P, 128)
    w_eff = jnp.pad(w_eff, ((0, 0), (0, P_pad - P))).astype(mxu_dtype)
    b_eff = jnp.pad(b_eff, (0, P_pad - P))[None, :].astype(jnp.float32)

    # Flat row layout (one fused XLA transpose + reshape): rows = B*M.
    N = B * M
    rows = jnp.transpose(x, (0, 2, 1)).reshape(N, L).astype(jnp.float32)

    # Row tile: 256 when there are enough rows (v6e/v7x MXU-sized; use 128 on
    # v5e), otherwise a single sublane-aligned tile covering all rows.
    row_tile = 256 if N >= 256 else _round_up(N, 8)
    N_pad = _round_up(N, row_tile)
    if N_pad != N:
        # Padded rows produce finite garbage (var=0 -> rstd=1/sqrt(eps)),
        # sliced off below.
        rows = jnp.pad(rows, ((0, N_pad - N), (0, 0)))
    grid = (N_pad // row_tile,)

    cost = pl.CostEstimate(
        flops=2 * N_pad * L * P_pad,
        transcendentals=2 * N_pad,
        bytes_accessed=(4 * (N_pad * L + N_pad * P_pad + P_pad)
                        + L * P_pad * jnp.dtype(mxu_dtype).itemsize),
    )

    # ---- Single fused pallas_call (grid over row tiles) ---------------------
    out = pl.pallas_call(
        pathformer_rows_kernel,
        out_shape=jax.ShapeDtypeStruct((N_pad, P_pad), jnp.float32),
        grid=grid,
        in_specs=[
            pl.BlockSpec((row_tile, L), lambda i: (i, 0)),
            pl.BlockSpec((L, P_pad), lambda i: (0, 0)),   # VMEM-resident
            pl.BlockSpec((1, P_pad), lambda i: (0, 0)),   # VMEM-resident
        ],
        out_specs=pl.BlockSpec((row_tile, P_pad), lambda i: (i, 0)),
        compiler_params=pltpu.CompilerParams(
            dimension_semantics=("parallel",)),
        cost_estimate=cost,
    )(rows, w_eff, b_eff)

    # Un-pad and restore the module's [B, pred_len, M] output layout.
    y = out[:N, :P].reshape(B, M, P)
    return jnp.transpose(y, (0, 2, 1))


# --------------------------------------------------------------------------
# Pure-JAX reference (unfolded path, mirrors the PyTorch forward)
# --------------------------------------------------------------------------
def pathformer_ref(x, params):
    B, L, M = x.shape
    mean = jnp.mean(x, axis=1, keepdims=True)
    std = jnp.sqrt(jnp.var(x, axis=1, keepdims=True) + EPS)
    xn = (x - mean) / std
    w_fc, b_fc = params["start_fc_w"], params["start_fc_b"]
    h = xn[..., None] * w_fc[0] + b_fc[0]                         # (B,L,M,D)
    h_flat = jnp.transpose(h, (0, 2, 1, 3)).reshape(B, M, -1)     # (B,M,L*D)
    y = h_flat @ params["proj_w"] + params["proj_b"][0]           # (B, M, P)
    dec = jnp.transpose(y, (0, 2, 1))                             # (B, P, M)
    return dec * std + mean


# --------------------------------------------------------------------------
if __name__ == "__main__":
    # small configs: seq_len=16, enc_in=4, d_model=32, pred_len=8
    B, L, M, D, P = 2, 16, 4, 32, 8

    key = jax.random.PRNGKey(0)
    k_x, k_w1, k_b1, k_w2, k_b2 = jax.random.split(key, 5)

    x = jax.random.normal(k_x, (B, L, M), dtype=jnp.float32)

    params = {
        # start_fc: nn.Linear(1, D) -> weight (D,1) stored here as (1, D)
        "start_fc_w": jax.random.normal(k_w1, (1, D), jnp.float32) * 0.5,
        "start_fc_b": jax.random.normal(k_b1, (1, D), jnp.float32) * 0.1,
        # projections: nn.Linear(L*D, P) -> weight stored transposed (L*D, P)
        "proj_w": jax.random.normal(k_w2, (L * D, P), jnp.float32)
        * (1.0 / np.sqrt(L * D)),
        "proj_b": jax.random.normal(k_b2, (1, P), jnp.float32) * 0.1,
    }

    out = pathformer_forward(x, params)
    out = jax.block_until_ready(out)

    ref = pathformer_ref(x, params)
    assert out.shape == (B, P, M), out.shape
    np.testing.assert_allclose(np.asarray(out), np.asarray(ref),
                               rtol=1e-4, atol=1e-4)

    print("KERNEL_OK")
</pallas_src>

<mosaic_0001>
module attributes {stable_mosaic.version = 11 : i64} {
  func.func @pathformer_rows_kernel(%arg0: i32, %arg1: memref<8x16xf32, #tpu.memory_space<vmem>>, %arg2: memref<16x128xf32, #tpu.memory_space<vmem>>, %arg3: memref<1x128xf32, #tpu.memory_space<vmem>>, %arg4: memref<8x128xf32, #tpu.memory_space<vmem>>) attributes {dimension_semantics = [#tpu.dimension_semantics<parallel>], iteration_bounds = array<i64: 1>, scalar_prefetch = 0 : i64, scratch_operands = 0 : i64, tpu.core_type = #tpu.core_type<tc>, window_params = [{transform_indices = @transform_0, window_bounds = array<i64: 8, 16>}, {pipeline_mode = #tpu.pipeline_mode<synchronous>, transform_indices = @transform_1, window_bounds = array<i64: 16, 128>}, {pipeline_mode = #tpu.pipeline_mode<synchronous>, transform_indices = @transform_2, window_bounds = array<i64: 1, 128>}, {transform_indices = @transform_3, window_bounds = array<i64: 8, 128>}]} {
    %c0 = arith.constant 0 : index
    %c0_0 = arith.constant 0 : index
    %0 = vector.load %arg1[%c0, %c0_0] : memref<8x16xf32, #tpu.memory_space<vmem>>, vector<8x16xf32>
    %cst = arith.constant dense<0.000000e+00> : vector<8xf32>
    %1 = vector.multi_reduction <add>, %0, %cst [1] : vector<8x16xf32> to vector<8xf32>
    %2 = vector.shape_cast %1 : vector<8xf32> to vector<8x1xf32>
    %cst_1 = arith.constant 1.600000e+01 : f32
    %3 = vector.broadcast %cst_1 : f32 to vector<8x1xf32>
    %4 = arith.divf %2, %3 : vector<8x1xf32>
    %5 = vector.broadcast %4 : vector<8x1xf32> to vector<8x16xf32>
    %6 = arith.subf %0, %5 : vector<8x16xf32>
    %7 = arith.mulf %6, %6 : vector<8x16xf32>
    %cst_2 = arith.constant dense<0.000000e+00> : vector<8xf32>
    %8 = vector.multi_reduction <add>, %7, %cst_2 [1] : vector<8x16xf32> to vector<8xf32>
    %9 = vector.shape_cast %8 : vector<8xf32> to vector<8x1xf32>
    %cst_3 = arith.constant 1.600000e+01 : f32
    %10 = vector.broadcast %cst_3 : f32 to vector<8x1xf32>
    %11 = arith.divf %9, %10 : vector<8x1xf32>
    %cst_4 = arith.constant 9.99999974E-6 : f32
    %12 = vector.broadcast %cst_4 : f32 to vector<8x1xf32>
    %13 = arith.addf %11, %12 : vector<8x1xf32>
    %14 = math.rsqrt %13 : vector<8x1xf32>
    %cst_5 = arith.constant 9.99999974E-6 : f32
    %15 = vector.broadcast %cst_5 : f32 to vector<8x1xf32>
    %16 = arith.addf %11, %15 : vector<8x1xf32>
    %17 = math.sqrt %16 : vector<8x1xf32>
    %18 = vector.broadcast %4 : vector<8x1xf32> to vector<8x16xf32>
    %19 = arith.subf %0, %18 : vector<8x16xf32>
    %20 = vector.broadcast %14 : vector<8x1xf32> to vector<8x16xf32>
    %21 = arith.mulf %19, %20 : vector<8x16xf32>
    %c0_6 = arith.constant 0 : index
    %c0_7 = arith.constant 0 : index
    %22 = vector.load %arg2[%c0_6, %c0_7] : memref<16x128xf32, #tpu.memory_space<vmem>>, vector<16x128xf32>
    %cst_8 = arith.constant dense<0.000000e+00> : vector<8x128xf32>
    %23 = tpu.matmul %21, %22, %cst_8 {dimension_numbers = #tpu.dot_dimension_numbers<[1], [0], [0], [1], [0, 0, 1, 1], [], []>} : vector<8x16xf32>, vector<16x128xf32>, vector<8x128xf32> -> vector<8x128xf32>
    %c0_9 = arith.constant 0 : index
    %c0_10 = arith.constant 0 : index
    %24 = vector.load %arg3[%c0_9, %c0_10] : memref<1x128xf32, #tpu.memory_space<vmem>>, vector<1x128xf32>
    %25 = vector.broadcast %24 : vector<1x128xf32> to vector<8x128xf32>
    %26 = arith.addf %23, %25 : vector<8x128xf32>
    %27 = vector.broadcast %17 : vector<8x1xf32> to vector<8x128xf32>
    %28 = arith.mulf %26, %27 : vector<8x128xf32>
    %29 = vector.broadcast %4 : vector<8x1xf32> to vector<8x128xf32>
    %30 = arith.addf %28, %29 : vector<8x128xf32>
    %c0_11 = arith.constant 0 : index
    %c0_12 = arith.constant 0 : index
    %31 = vector.load %arg4[%c0_11, %c0_12] : memref<8x128xf32, #tpu.memory_space<vmem>>, vector<8x128xf32>
    tpu.vector_store %arg4[%c0_11, %c0_12], %30 {strides = array<i32>} : memref<8x128xf32, #tpu.memory_space<vmem>>, vector<8x128xf32>,
    return
  }
  func.func @transform_0(%arg0: i32) -> (i32, i32) {
    %c0_i32 = arith.constant 0 : i32
    %c0_i32_0 = arith.constant 0 : i32
    return %arg0, %c0_i32 : i32, i32
  }
  func.func @transform_1(%arg0: i32) -> (i32, i32) {
    %c0_i32 = arith.constant 0 : i32
    %c0_i32_0 = arith.constant 0 : i32
    %c0_i32_1 = arith.constant 0 : i32
    return %c0_i32, %c0_i32_0 : i32, i32
  }
  func.func @transform_2(%arg0: i32) -> (i32, i32) {
    %c0_i32 = arith.constant 0 : i32
    %c0_i32_0 = arith.constant 0 : i32
    %c0_i32_1 = arith.constant 0 : i32
    return %c0_i32, %c0_i32_0 : i32, i32
  }
  func.func @transform_3(%arg0: i32) -> (i32, i32) {
    %c0_i32 = arith.constant 0 : i32
    %c0_i32_0 = arith.constant 0 : i32
    return %arg0, %c0_i32 : i32, i32
  }
}

</mosaic_0001>

<bundles_post_ra>
// kernel: tpu_custom_call.1
= control target key start
LH: loop header
LB: loop body
LE: loop exit
PB: predicated region body
PF: predicated region fallthrough
CT: control target
= control target key end

     0   :  { %8 = vsyncpa [#allocation3], 0  ;;  %s294_s0 = inlined_call_operand.hbm [shape: f32[8,16], index: 0, kind: input, shape index: {}]   ;;  %s295_s1 = inlined_call_operand.hbm [shape: f32[16,128], index: 1, kind: input, shape index: {}]   ;;  %s296_s2 = inlined_call_operand.vmem [shape: f32[1,128], index: 2, kind: input, shape index: {}]   ;;  %s297_s3 = inlined_call_operand.hbm [shape: f32[8,128], index: 3, kind: output, shape index: {}]  }
   0x1   :  { %9 = vsyncpa [#allocation6], 0 }
   0x2   :  { %10 = vsyncpa [#allocation4], 0  ;;  %s252_s12 = smov [#allocation2]   ;;  %s253_s14 = smov [#allocation5]  }
   0x3   :  { %s17_s13 = sshll.u32 %s252_s12, 4  ;;  %s26_s15 = sshll.u32 %s253_s14, 4  ;;  %s18_s13 = int_to_ptr.vmem [resolvable:$true] %s17_s13  ;;  %s27_s15 = int_to_ptr.vmem [resolvable:$true] %s26_s15 }
   0x4   :  { %s194_s16 = scalar_lea.vmem %s18_s13, 128  ;;  %p199_p1 = scmp.lt.s32.totalorder %s18_s13, %s18_s13 }
   0x5   :  { %p195_p0 = scmp.ne.s32.totalorder %s18_s13, %s194_s16  ;;  %p200_p2 = scmp.lt.s32.totalorder %s194_s16, %s194_s16 }
   0x7   :  { %p201_p3 = por %p200_p2, %p199_p1 }
   0x9   :  { %p202_p4 = pnand %p201_p3, %p195_p0 }
   0xb   :  { %205 = shalt.err (!%p202_p4)
}
   0xc   :  { %20 = dma.hbm_to_vmem [thread:$0]  %s294_s0, 128, %s18_s13, [#allocation3]  }
   0xd   :  { %s214_s19 = scalar_lea.vmem %s27_s15, 256  ;;  %p219_p6 = scmp.lt.s32.totalorder %s27_s15, %s27_s15 }
   0xe   :  { %p215_p5 = scmp.ne.s32.totalorder %s27_s15, %s214_s19  ;;  %p220_p7 = scmp.lt.s32.totalorder %s214_s19, %s214_s19 }
  0x10   :  { %p221_p8 = por %p220_p7, %p219_p6 }
  0x12   :  { %p222_p9 = pnand %p221_p8, %p215_p5 }
  0x14   :  { %225 = shalt.err (!%p222_p9)
}
  0x15   :  { %s254_s20 = smov 128   ;;  %s255_s21 = smov 8  }
  0x16   :  { %32 = dma.hbm_to_vmem [thread:$0]  %s295_s1, 256, %s27_s15, [#allocation6], %s254_s20, %s254_s20, %s255_s21  }
  0x17   :  { %246 = dma.done.wait [#allocation3], 128  }
  0x18   :  { %247 = vsyncadd [#allocation3], 4294967168 }
  0x19   :  { %248 = dma.done.wait [#allocation6], 256  }
  0x1a   :  { %249 = vsyncadd [#allocation6], 4294967040  ;;  %vm42_vm0 = vcmask 130048   ;;  %v41_v0 = vld [vmem:[#allocation2] sm:$0xff]  ;;  %v65_v7 = vld [vmem:[#allocation5 + $0x8] sm:$0xff]  ;;  %v256_v8 = vmov 0.0  }
  0x1b   :  { %v43_v1 = vsel %vm42_vm0, %v41_v0, 0.0  ;;  %170 = vmatprep.subr.mxu0 %v256_v8  ;;  %v64_v9 = vld [vmem:[#allocation5] sm:$0xff]  ;;  %vm257_vm1 = vmmov 0   ;;  %v165_v19 = vld [vmem:[%s296_s2] ss:$0 sm:$0xff]  ;;  %s258_s24 = smov [#allocation7]  }
  0x1c   :  { %44 = vadd.xlane.f32.xlu0 %v43_v1  ;;  %174 = vmatprep.mubr.msk.f32.mxu0 %vm257_vm1, %v256_v8  ;;  %s155_s25 = sshll.u32 %s258_s24, 4  ;;  %s156_s25 = int_to_ptr.vmem [resolvable:$true] %s155_s25 }
  0x1d   :  { %171 = vmatpush3.msra.mxu0 %v65_v7  ;;  %s226_s26 = scalar_lea.vmem %s156_s25, 128  ;;  %p231_p11 = scmp.lt.s32.totalorder %s156_s25, %s156_s25 }
  0x1e   :  { %172 = vmatprep.subr.mxu0 %v256_v8  ;;  %p227_p10 = scmp.ne.s32.totalorder %s156_s25, %s226_s26  ;;  %p232_p12 = scmp.lt.s32.totalorder %s226_s26, %s226_s26 }
  0x1f   :  { %173 = vmatpush3.msra.mxu0 %v64_v9 }
  0x20   :  { %p233_p13 = por %p232_p12, %p231_p11 }
  0x22   :  { %p234_p0 = pnand %p233_p13, %p227_p10 }
  0xa5   :  { %v45_v2 = vpop.xlane.xlu0 %44 }
  0xa6   :  { %v47_v3 = vmul.f32 0.0625, %v45_v2 }
  0xa8   :  { %v48_v4 = vsub.f32 %v41_v0, %v47_v3 }
  0xaa   :  { %v49_v5 = vmul.f32 %v48_v4, %v48_v4 }
  0xac   :  { %v50_v6 = vsel %vm42_vm0, %v49_v5, 0.0 }
  0xad   :  { %51 = vadd.xlane.f32.xlu0 %v50_v6 }
 0x136   :  { %v52_v10 = vpop.xlane.xlu0 %51 }
 0x137   :  { %v53_v11 = vmul.f32 0.0625, %v52_v10 }
 0x139   :  { %v54_v12 = vadd.f32 1e-05, %v53_v11 }
 0x13b   :  { %184 = vrsqrt.f32 %v54_v12  ;;  %vm58_vm2 = vcmp.eq.f32.partialorder %v54_v12, inf  ;;  %v61_v16 = vand.u32 2147483648, %v54_v12  ;;  %vm60_vm3 = vcmp.eq.f32.partialorder %v54_v12, 0.0 }
 0x148   :  { %v185_v13 = vpop.eup %184 }
 0x149   :  { %v63_v14 = vmul.f32 %v185_v13, %v48_v4  ;;  %v57_v15 = vmul.f32 %v185_v13, %v54_v12 }
 0x14b   :  { %175 = vmatmul.mubr.msk.f32.vlgmr.msra.gmra.mxu0 %vm42_vm0, %v63_v14  ;;  %v59_v17 = vsel %vm58_vm2, %v54_v12, %v57_v15 }
 0x14c   :  { %v62_v18 = vsel %vm60_vm3, %v61_v16, %v59_v17 }
 0x20b   :  { %v142_v20 = vpop.f32.mrf.mxu0 }
 0x20c   :  { %v143_v21 = vadd.f32 %v165_v19, %v142_v20 }
 0x20d   :  { %v176_v22 = vpop.f32.mrf.mxu0 }
 0x20e   :  { %v146_v23 = vmul.f32 %v143_v21, %v62_v18 }
 0x210   :  { %v147_v24 = vadd.f32 %v146_v23, %v47_v3 }
 0x212   :  { %148 = vst [vmem:[#allocation7] sm:$0xff] %v147_v24 }
 0x213   :  { %237 = shalt.err (!%p234_p0)
}
 0x214   :  { %158 = dma.vmem_to_hbm [thread:$0]  %s156_s25, 128, %s297_s3, [#allocation4]  }
 0x215   :  { %250 = dma.done.wait [#allocation4], 128  }
 0x216   :  { %251 = vsyncadd [#allocation4], 4294967168 }
 0x217   :  { %162 = vsyncpa [#allocation3], 1 }
 0x218   :  { %163 = vsyncpa [#allocation6], 1 }
 0x219   :  { %164 = vsyncpa [#allocation4], 1 }

</bundles_post_ra>
